<compile_context>
chip_gen: v7x
topology: tpu7x:2x2x1
jax: 0.10.0
libtpu: 0.0.40
codegen_flags: <defaults>
</compile_context>

<pallas_src>
import jax
import jax.numpy as jnp
from jax.experimental import pallas as pl
from jax.experimental.pallas import tpu as pltpu


def _cdiv(a, b):
    return -(-a // b)


# ----------------------------------------------------------------------------
# Kernels
# ----------------------------------------------------------------------------

def _senet_fused_kernel(x_ref, w1t_ref, w2t_ref, o_ref):
    # x_ref / o_ref: (bblk, C, L); w1t_ref: (C, H) f32; w2t_ref: (H, C) f32
    # Squeeze: AdaptiveAvgPool1d(1) == mean over L, accumulated in f32
    # (no full-tile f32 upcast is materialized).
    avg = jnp.mean(x_ref[...], axis=-1, dtype=jnp.float32)          # (bblk, C)

    # Excite: Linear(C->H, no bias) -> SiLU -> Linear(H->C, no bias) -> Sigmoid
    h = jnp.dot(avg, w1t_ref[...], preferred_element_type=jnp.float32)
    h = h * jax.nn.sigmoid(h)                                        # SiLU
    s = jax.nn.sigmoid(jnp.dot(h, w2t_ref[...],
                               preferred_element_type=jnp.float32))  # (bblk, C)

    # Scale: re-read x from VMEM (don't keep the multi-MB tile live across the
    # excite chain) and store in the native dtype.
    o_ref[...] = x_ref[...] * s.astype(o_ref.dtype)[:, :, None]


def _make_two_phase_kernel(L_total, tl):
    """Two-phase kernel for large C*L: phase 0 reduces, phase 1 scales."""
    rem = L_total % tl            # static: last L tile is padded if rem != 0
    inv_l = 1.0 / float(L_total)

    def kernel(x_ref, w1t_ref, w2t_ref, o_ref, sum_ref, gate_ref):
        # x_ref / o_ref: (bblk, C, tl); sum_ref: (bblk, C) f32;
        # gate_ref: (bblk, C, 1) in x dtype.
        p = pl.program_id(1)          # 0 = reduce, 1 = scale
        l = pl.program_id(2)
        nl = pl.num_programs(2)

        @pl.when(jnp.logical_and(p == 0, l == 0))
        def _init():
            sum_ref[...] = jnp.zeros_like(sum_ref)

        @pl.when(p == 0)
        def _reduce():
            x = x_ref[...]
            if rem:  # static: mask the padded tail columns of the last tile
                col = l * tl + jax.lax.broadcasted_iota(jnp.int32, x.shape, 2)
                x = jnp.where(col < L_total, x, jnp.zeros_like(x))
            sum_ref[...] += jnp.sum(x, axis=-1, dtype=jnp.float32)

        @pl.when(jnp.logical_and(p == 0, l == nl - 1))
        def _gate():
            avg = sum_ref[...] * jnp.float32(inv_l)                   # (bblk, C)
            h = jnp.dot(avg, w1t_ref[...], preferred_element_type=jnp.float32)
            h = h * jax.nn.sigmoid(h)                                  # SiLU
            s = jax.nn.sigmoid(jnp.dot(h, w2t_ref[...],
                                       preferred_element_type=jnp.float32))
            gate_ref[...] = s.astype(gate_ref.dtype)[:, :, None]

        @pl.when(p == 1)
        def _scale():
            o_ref[...] = x_ref[...] * gate_ref[...]

    return kernel


# ----------------------------------------------------------------------------
# Tiling helpers
# ----------------------------------------------------------------------------

def _vmem_limit_bytes():
    """Per-TensorCore scoped VMEM limit (~3/4 of physical per-core VMEM)."""
    per_core = 128 << 20                       # v5e / v6e physical per TC
    try:
        kind = jax.devices()[0].device_kind.lower()
        if "v7" in kind or "7x" in kind:       # v7x: 64 MiB per TensorCore
            per_core = 64 << 20
    except Exception:
        pass
    try:
        cap = int(pltpu.get_tpu_info().vmem_capacity_bytes)
        per_core = min(per_core, cap)          # clamp if query is per-core
    except Exception:
        pass
    return (per_core * 3) // 4                 # 48 MiB v7x, 96 MiB v5e/v6e


def _pick_bblk(B, per_row_bytes, block_budget_bytes,
               target_steps=8, min_block_bytes=2 << 20):
    """Batch rows per grid step."""
    # in + out blocks, each double-buffered -> ~4 live copies in VMEM.
    max_by_vmem = max(1, block_budget_bytes // (4 * per_row_bytes))
    bblk = max(1, min(B, max_by_vmem))
    # Aim for >= target_steps grid steps (pipeline steady-state overlap and
    # several blocks per v7x TensorCore), but don't shrink blocks below
    # ~min_block_bytes where per-step overhead starts to dominate.
    rows_target = max(1, B // target_steps)
    rows_floor = max(1, min_block_bytes // per_row_bytes)
    bblk = max(1, min(bblk, max(rows_target, rows_floor), B))
    # Prefer an even number of steps so both v7x TensorCores get equal work
    # on the "parallel" batch axis.
    steps = _cdiv(B, bblk)
    if steps > 1 and steps % 2:
        cand = max(1, _cdiv(B, steps + 1))
        if _cdiv(B, cand) % 2 == 0:
            bblk = cand
    return bblk


# ----------------------------------------------------------------------------
# Forward paths
# ----------------------------------------------------------------------------

def _senet_fused(x, w1t, w2t, budget, vmem_limit, donate_x, block_rows):
    B, C, L = x.shape
    H = w1t.shape[1]
    itemsize = jnp.dtype(x.dtype).itemsize
    bblk = block_rows if block_rows else _pick_bblk(B, C * L * itemsize, budget)
    bblk = max(1, min(int(bblk), B))
    nb = _cdiv(B, bblk)
    cost = pl.CostEstimate(
        flops=2 * B * C * L + 4 * B * C * H,
        transcendentals=B * (H + C),
        bytes_accessed=2 * B * C * L * itemsize + 8 * C * H)
    extra = dict(input_output_aliases={0: 0}) if donate_x else {}
    return pl.pallas_call(
        _senet_fused_kernel,
        out_shape=jax.ShapeDtypeStruct((B, C, L), x.dtype),
        grid_spec=pltpu.PrefetchScalarGridSpec(
            num_scalar_prefetch=0,
            grid=(nb,),
            in_specs=[
                pl.BlockSpec((bblk, C, L), lambda b: (b, 0, 0)),
                pl.BlockSpec((C, H), lambda b: (0, 0)),   # VMEM-resident
                pl.BlockSpec((H, C), lambda b: (0, 0)),   # VMEM-resident
            ],
            out_specs=pl.BlockSpec((bblk, C, L), lambda b: (b, 0, 0)),
        ),
        compiler_params=pltpu.CompilerParams(
            dimension_semantics=("parallel",),
            vmem_limit_bytes=vmem_limit,
        ),
        cost_estimate=cost,
        **extra,
    )(x, w1t, w2t)


def _senet_two_phase(x, w1t, w2t, budget, vmem_limit, donate_x,
                     block_rows, lane_tile):
    """Single-kernel fallback for (C, L) slabs too large for VMEM."""
    B, C, L = x.shape
    H = w1t.shape[1]
    itemsize = jnp.dtype(x.dtype).itemsize

    # Lane-dense L tiles (multiple of 128); a non-dividing tail tile is padded
    # by Pallas and masked inside the kernel.
    if lane_tile is not None:
        tl = int(lane_tile)
    elif L >= 128:
        max_tl = max(128, ((budget // (4 * C * itemsize)) // 128) * 128)
        tl = min(max_tl, _cdiv(L, 128) * 128)
        if tl >= L:
            tl = L
    else:
        tl = L
    nl = _cdiv(L, tl)

    bblk = block_rows if block_rows else _pick_bblk(B, C * tl * itemsize, budget)
    bblk = max(1, min(int(bblk), B))
    nb = _cdiv(B, bblk)

    cost = pl.CostEstimate(
        flops=2 * B * C * L + 4 * B * C * H,
        transcendentals=B * (H + C),
        bytes_accessed=3 * B * C * L * itemsize + 8 * C * H)
    extra = dict(input_output_aliases={0: 0}) if donate_x else {}

    # Output writeback only during phase 1: the out block index is pinned to
    # (b, 0, 0) while p == 0, so no intermediate writebacks happen there.
    return pl.pallas_call(
        _make_two_phase_kernel(L, tl),
        out_shape=jax.ShapeDtypeStruct((B, C, L), x.dtype),
        grid_spec=pltpu.PrefetchScalarGridSpec(
            num_scalar_prefetch=0,
            grid=(nb, 2, nl),
            in_specs=[
                pl.BlockSpec((bblk, C, tl), lambda b, p, l: (b, 0, l)),
                pl.BlockSpec((C, H), lambda b, p, l: (0, 0)),   # resident
                pl.BlockSpec((H, C), lambda b, p, l: (0, 0)),   # resident
            ],
            out_specs=pl.BlockSpec((bblk, C, tl), lambda b, p, l: (b, 0, l * p)),
            scratch_shapes=[
                pltpu.VMEM((bblk, C), jnp.float32),    # running sum
                pltpu.VMEM((bblk, C, 1), x.dtype),     # gate, x's dtype
            ],
        ),
        compiler_params=pltpu.CompilerParams(
            dimension_semantics=("parallel", "arbitrary", "arbitrary"),
            vmem_limit_bytes=vmem_limit,
        ),
        cost_estimate=cost,
        **extra,
    )(x, w1t, w2t)


def senet_forward(x, w1t, w2t, *, donate_x=False, block_rows=None,
                  lane_tile=None, force_two_phase=False):
    """SENet forward.

    x:   (B, C, L)
    w1t: (C, H)  == fc[0].weight.T   (pre-transposed once, outside the hot path)
    w2t: (H, C)  == fc[2].weight.T
    """
    B, C, L = x.shape
    H = w1t.shape[1]
    assert w1t.shape == (C, H) and w2t.shape == (H, C)
    itemsize = jnp.dtype(x.dtype).itemsize

    # Tiny weights as f32 once in the wrapper (no per-step converts in-kernel).
    w1t = w1t.astype(jnp.float32)
    w2t = w2t.astype(jnp.float32)

    vmem_limit = _vmem_limit_bytes()
    # ~85% of the scoped limit for the double-buffered x/o block set; the
    # (few-KiB) resident weights are accounted for explicitly.
    w_bytes = 8 * C * H
    budget = max(4 * 1024, (vmem_limit * 17) // 20 - 2 * w_bytes)
    # TODO(synk): if C*H is so large that the weights alone overflow VMEM, the
    # excite matmuls would need K-tiling; not expected for an SE block.

    if not force_two_phase and 4 * C * L * itemsize <= budget:
        return _senet_fused(x, w1t, w2t, budget, vmem_limit, donate_x,
                            block_rows)
    return _senet_two_phase(x, w1t, w2t, budget, vmem_limit, donate_x,
                            block_rows, lane_tile)


# ----------------------------------------------------------------------------
# Pure-JAX reference (mirrors the PyTorch forward)
# ----------------------------------------------------------------------------

def senet_reference(x, w1, w2):
    avg = jnp.mean(x, axis=-1)                   # (B, C)
    h = avg @ w1.T                               # (B, H)
    h = h * jax.nn.sigmoid(h)                    # SiLU
    s = jax.nn.sigmoid(h @ w2.T)                 # (B, C)
    return x * s[:, :, None]


if __name__ == "__main__":
    key = jax.random.PRNGKey(0)

    def run_case(B, C, L, H, key, **kw):
        kx, k1, k2, key = jax.random.split(key, 4)
        x = jax.random.normal(kx, (B, C, L), dtype=jnp.float32)
        # nn.Linear layout weights (out, in), deterministic Kaiming-ish scale.
        w1 = jax.random.normal(k1, (H, C), dtype=jnp.float32) / jnp.sqrt(C)
        w2 = jax.random.normal(k2, (C, H), dtype=jnp.float32) / jnp.sqrt(H)
        out = jax.block_until_ready(
            senet_forward(x, jnp.transpose(w1), jnp.transpose(w2), **kw))
        ref = senet_reference(x, w1, w2)
        assert out.shape == (B, C, L)
        assert jnp.allclose(out, ref, atol=1e-4, rtol=1e-4), f"mismatch: {kw}"
        return key

    # 1) fused single-pass path, default tiling.
    key = run_case(16, 8, 256, 8, key)
    # 2) fused path, forced multi-step grid with a partial tail batch block.
    key = run_case(10, 8, 256, 8, key, block_rows=4)
    # 3) two-phase (large-C*L fallback) path, lane-dense L tiles.
    key = run_case(4, 8, 384, 8, key, force_two_phase=True, lane_tile=128)
    # 4) two-phase path with a masked (non-multiple-of-128) L tail.
    key = run_case(4, 8, 200, 8, key, force_two_phase=True, lane_tile=128)

    print("KERNEL_OK")
</pallas_src>

<mosaic_0001>
module attributes {stable_mosaic.version = 11 : i64} {
  func.func @_senet_fused_kernel(%arg0: i32, %arg1: memref<16x8x256xf32, #tpu.memory_space<vmem>>, %arg2: memref<8x8xf32, #tpu.memory_space<vmem>>, %arg3: memref<8x8xf32, #tpu.memory_space<vmem>>, %arg4: memref<16x8x256xf32, #tpu.memory_space<vmem>>) attributes {dimension_semantics = [#tpu.dimension_semantics<parallel>], iteration_bounds = array<i64: 1>, scalar_prefetch = 0 : i64, scratch_operands = 0 : i64, tpu.core_type = #tpu.core_type<tc>, window_params = [{transform_indices = @transform_0, window_bounds = array<i64: 16, 8, 256>}, {pipeline_mode = #tpu.pipeline_mode<synchronous>, transform_indices = @transform_1, window_bounds = array<i64: 8, 8>}, {pipeline_mode = #tpu.pipeline_mode<synchronous>, transform_indices = @transform_2, window_bounds = array<i64: 8, 8>}, {transform_indices = @transform_3, window_bounds = array<i64: 16, 8, 256>}]} {
    %c0 = arith.constant 0 : index
    %c0_0 = arith.constant 0 : index
    %c0_1 = arith.constant 0 : index
    %0 = vector.load %arg1[%c0, %c0_0, %c0_1] : memref<16x8x256xf32, #tpu.memory_space<vmem>>, vector<16x8x256xf32>
    %cst = arith.constant dense<0.000000e+00> : vector<16x8xf32>
    %1 = vector.multi_reduction <add>, %0, %cst [2] : vector<16x8x256xf32> to vector<16x8xf32>
    %cst_2 = arith.constant 2.560000e+02 : f32
    %2 = vector.broadcast %cst_2 : f32 to vector<16x8xf32>
    %3 = arith.divf %1, %2 : vector<16x8xf32>
    %c0_3 = arith.constant 0 : index
    %c0_4 = arith.constant 0 : index
    %4 = vector.load %arg2[%c0_3, %c0_4] : memref<8x8xf32, #tpu.memory_space<vmem>>, vector<8x8xf32>
    %cst_5 = arith.constant dense<0.000000e+00> : vector<16x8xf32>
    %5 = tpu.matmul %3, %4, %cst_5 {dimension_numbers = #tpu.dot_dimension_numbers<[1], [0], [0], [1], [0, 0, 1, 1], [], []>} : vector<16x8xf32>, vector<8x8xf32>, vector<16x8xf32> -> vector<16x8xf32>
    %6 = arith.negf %5 : vector<16x8xf32>
    %7 = math.exp %6 : vector<16x8xf32>
    %cst_6 = arith.constant 1.000000e+00 : f32
    %8 = vector.broadcast %cst_6 : f32 to vector<16x8xf32>
    %9 = arith.addf %8, %7 : vector<16x8xf32>
    %10 = arith.divf %8, %9 : vector<16x8xf32>
    %11 = arith.mulf %5, %10 : vector<16x8xf32>
    %c0_7 = arith.constant 0 : index
    %c0_8 = arith.constant 0 : index
    %12 = vector.load %arg3[%c0_7, %c0_8] : memref<8x8xf32, #tpu.memory_space<vmem>>, vector<8x8xf32>
    %cst_9 = arith.constant dense<0.000000e+00> : vector<16x8xf32>
    %13 = tpu.matmul %11, %12, %cst_9 {dimension_numbers = #tpu.dot_dimension_numbers<[1], [0], [0], [1], [0, 0, 1, 1], [], []>} : vector<16x8xf32>, vector<8x8xf32>, vector<16x8xf32> -> vector<16x8xf32>
    %14 = arith.negf %13 : vector<16x8xf32>
    %15 = math.exp %14 : vector<16x8xf32>
    %cst_10 = arith.constant 1.000000e+00 : f32
    %16 = vector.broadcast %cst_10 : f32 to vector<16x8xf32>
    %17 = arith.addf %16, %15 : vector<16x8xf32>
    %18 = arith.divf %16, %17 : vector<16x8xf32>
    %c0_11 = arith.constant 0 : index
    %c0_12 = arith.constant 0 : index
    %c0_13 = arith.constant 0 : index
    %19 = vector.load %arg1[%c0_11, %c0_12, %c0_13] : memref<16x8x256xf32, #tpu.memory_space<vmem>>, vector<16x8x256xf32>
    %20 = vector.shape_cast %18 : vector<16x8xf32> to vector<16x8x1xf32>
    %21 = vector.broadcast %20 : vector<16x8x1xf32> to vector<16x8x256xf32>
    %22 = arith.mulf %19, %21 : vector<16x8x256xf32>
    %c0_14 = arith.constant 0 : index
    %c0_15 = arith.constant 0 : index
    %c0_16 = arith.constant 0 : index
    %23 = vector.load %arg4[%c0_14, %c0_15, %c0_16] : memref<16x8x256xf32, #tpu.memory_space<vmem>>, vector<16x8x256xf32>
    tpu.vector_store %arg4[%c0_14, %c0_15, %c0_16], %22 {strides = array<i32>} : memref<16x8x256xf32, #tpu.memory_space<vmem>>, vector<16x8x256xf32>,
    return
  }
  func.func @transform_0(%arg0: i32) -> (i32, i32, i32) {
    %c0_i32 = arith.constant 0 : i32
    %c0_i32_0 = arith.constant 0 : i32
    %c0_i32_1 = arith.constant 0 : i32
    return %arg0, %c0_i32, %c0_i32_0 : i32, i32, i32
  }
  func.func @transform_1(%arg0: i32) -> (i32, i32) {
    %c0_i32 = arith.constant 0 : i32
    %c0_i32_0 = arith.constant 0 : i32
    %c0_i32_1 = arith.constant 0 : i32
    return %c0_i32, %c0_i32_0 : i32, i32
  }
  func.func @transform_2(%arg0: i32) -> (i32, i32) {
    %c0_i32 = arith.constant 0 : i32
    %c0_i32_0 = arith.constant 0 : i32
    %c0_i32_1 = arith.constant 0 : i32
    return %c0_i32, %c0_i32_0 : i32, i32
  }
  func.func @transform_3(%arg0: i32) -> (i32, i32, i32) {
    %c0_i32 = arith.constant 0 : i32
    %c0_i32_0 = arith.constant 0 : i32
    %c0_i32_1 = arith.constant 0 : i32
    return %arg0, %c0_i32, %c0_i32_0 : i32, i32, i32
  }
}

</mosaic_0001>

<bundles_post_ra>
// kernel: tpu_custom_call.1
= control target key start
LH: loop header
LB: loop body
LE: loop exit
PB: predicated region body
PF: predicated region fallthrough
CT: control target
= control target key end

     0   :  { %8 = vsyncpa [#allocation3], 0  ;;  %s1037_s0 = inlined_call_operand.hbm [shape: f32[16,8,256], index: 0, kind: input, shape index: {}]   ;;  %s1038_s1 = inlined_call_operand.hbm [shape: f32[8,8], index: 1, kind: input, shape index: {}]   ;;  %s1039_s2 = inlined_call_operand.hbm [shape: f32[8,8], index: 2, kind: input, shape index: {}]   ;;  %s1040_s3 = inlined_call_operand.hbm [shape: f32[16,8,256], index: 3, kind: output, shape index: {}]  }
   0x1   :  { %9 = vsyncpa [#allocation6], 0 }
   0x2   :  { %10 = vsyncpa [#allocation4], 0  ;;  %s775_s12 = smov [#allocation5]   ;;  %s776_s14 = smov [#allocation2]  }
   0x3   :  { %s29_s13 = sshll.u32 %s775_s12, 4  ;;  %s16_s15 = sshll.u32 %s776_s14, 4  ;;  %s30_s13 = int_to_ptr.vmem [resolvable:$true] %s29_s13  ;;  %s801_s15 = int_to_ptr.vmem [resolvable:$true] %s16_s15 }
   0x4   :  { %s681_s18 = scalar_lea.hbm %s1038_s1, 128 }
   0x5   :  { %p682_p0 = scmp.ne.s32.totalorder %s1038_s1, %s681_s18  ;;  %p685_p1 = scmp.lt.u32.totalorder %s681_s18, %s1038_s1 }
   0x7   :  { %p687_p2 = pnand %p685_p1, %p682_p0 }
   0x9   :  { %690 = shalt.err (!%p687_p2)
}
   0xa   :  { %s691_s23 = scalar_lea.vmem %s30_s13, 128  ;;  %p696_p4 = scmp.lt.s32.totalorder %s30_s13, %s30_s13 }
   0xb   :  { %p692_p3 = scmp.ne.s32.totalorder %s30_s13, %s691_s23  ;;  %p697_p5 = scmp.lt.s32.totalorder %s691_s23, %s691_s23 }
   0xd   :  { %p698_p6 = por %p697_p5, %p696_p4 }
   0xf   :  { %p699_p7 = pnand %p698_p6, %p692_p3 }
  0x11   :  { %702 = shalt.err (!%p699_p7)
}
  0x12   :  { %32 = dma.hbm_to_vmem [thread:$0]  %s1038_s1, 128, %s30_s13, [#allocation6]  }
  0x13   :  { %s703_s28 = scalar_lea.hbm %s1037_s0, 4096 }
  0x14   :  { %p704_p8 = scmp.ne.s32.totalorder %s1037_s0, %s703_s28  ;;  %p707_p9 = scmp.lt.u32.totalorder %s703_s28, %s1037_s0 }
  0x16   :  { %p709_p10 = pnand %p707_p9, %p704_p8 }
  0x18   :  { %712 = shalt.err (!%p709_p10)
}
  0x19   :  { %s713_s6 = scalar_lea.vmem %s801_s15, 4096  ;;  %p718_p12 = scmp.lt.s32.totalorder %s801_s15, %s801_s15 }
  0x1a   :  { %p714_p11 = scmp.ne.s32.totalorder %s801_s15, %s713_s6  ;;  %p719_p13 = scmp.lt.s32.totalorder %s713_s6, %s713_s6 }
  0x1c   :  { %p720_p0 = por %p719_p13, %p718_p12 }
  0x1e   :  { %p721_p1 = pnand %p720_p0, %p714_p11 }
  0x20   :  { %724 = shalt.err (!%p721_p1)
}
  0x21   :  { %s777_s1 = smov 256   ;;  %s778_s7 = smov 16  }
  0x22   :  { %22 = dma.hbm_to_vmem [thread:$0]  %s1037_s0, 4096, %s801_s15, [#allocation3], %s777_s1, %s777_s1, %s778_s7  }
  0x23   :  { %s779_s10 = smov [#allocation7]   ;;  %s725_s14 = scalar_lea.hbm %s1039_s2, 128 }
  0x24   :  { %s39_s11 = sshll.u32 %s779_s10, 4  ;;  %p726_p2 = scmp.ne.s32.totalorder %s1039_s2, %s725_s14  ;;  %s40_s11 = int_to_ptr.vmem [resolvable:$true] %s39_s11 }
  0x25   :  { %p729_p3 = scmp.lt.u32.totalorder %s725_s14, %s1039_s2 }
  0x27   :  { %p731_p4 = pnand %p729_p3, %p726_p2 }
  0x29   :  { %734 = shalt.err (!%p731_p4)
}
  0x2a   :  { %s735_s20 = scalar_lea.vmem %s40_s11, 128  ;;  %p740_p6 = scmp.lt.s32.totalorder %s40_s11, %s40_s11 }
  0x2b   :  { %p736_p5 = scmp.ne.s32.totalorder %s40_s11, %s735_s20  ;;  %p741_p7 = scmp.lt.s32.totalorder %s735_s20, %s735_s20 }
  0x2d   :  { %p742_p8 = por %p741_p7, %p740_p6 }
  0x2f   :  { %p743_p9 = pnand %p742_p8, %p736_p5 }
  0x31   :  { %746 = shalt.err (!%p743_p9)
}
  0x32   :  { %42 = dma.hbm_to_vmem [thread:$0]  %s1039_s2, 128, %s40_s11, [#allocation6]  }
  0x33   :  { %769 = dma.done.wait [#allocation3], 4096  }
  0x34   :  { %770 = vsyncadd [#allocation3], 4294963200 }
  0x35   :  { %771 = dma.done.wait [#allocation6], 256  }
  0x36   :  { %772 = vsyncadd [#allocation6], 4294967040  ;;  %v847_v0 = vld [vmem:[#allocation2 + $0x20] sm:$0xff]  ;;  %v849_v1 = vld [vmem:[#allocation2 + $0x28] sm:$0xff]  ;;  %v166_v53 = vlaneseq  ;;  %vm232_vm0 = vcmask 1041409   ;;  %vm234_vm1 = vcmask 1042434  }
  0x37   :  { %v851_v2 = vld [vmem:[#allocation2] sm:$0xff]  ;;  %v90_v3 = vadd.f32 %v849_v1, %v847_v0  ;;  %v855_v4 = vld [vmem:[#allocation2 + $0x8] sm:$0xff]  ;;  %v863_v8 = vld [vmem:[#allocation2 + $0x10] sm:$0xff]  ;;  %vm236_vm2 = vcmask 1043459   ;;  %vm238_vm3 = vcmask 1044484   ;;  %vm240_vm4 = vcmask 1045509  }
  0x38   :  { %v857_v5 = vld [vmem:[#allocation2 + $0x80] sm:$0xff]  ;;  %v859_v6 = vld [vmem:[#allocation2 + $0x88] sm:$0xff]  ;;  %v84_v7 = vadd.f32 %v855_v4, %v851_v2  ;;  %v865_v9 = vld [vmem:[#allocation2 + $0x18] sm:$0xff]  ;;  %v167_v56 = vand.u32 127, %v166_v53  ;;  %v943_v57 = vshrl.u32 %v166_v53, 7  ;;  %vm242_vm5 = vcmask 1046534  }
  0x39   :  { %91 = vadd.xlane.f32.xlu1 %v90_v3  ;;  %v108_v10 = vadd.f32 %v859_v6, %v857_v5  ;;  %v87_v11 = vadd.f32 %v865_v9, %v863_v8  ;;  %v871_v12 = vld [vmem:[#allocation2 + $0x30] sm:$0xff]  ;;  %v873_v13 = vld [vmem:[#allocation2 + $0x38] sm:$0xff]  ;;  %v883_v18 = vld [vmem:[#allocation2 + $0x40] sm:$0xff]  ;;  %vm244_vm6 = vcmask 1047559   ;;  %vm253_vm7 = vcmask 64512   ;;  %s780_s2 = smov [#allocation8]  }
  0x3a   :  { %85 = vadd.xlane.f32.xlu0 %v84_v7  ;;  %v875_v14 = vld [vmem:[#allocation2 + $0x90] sm:$0xff]  ;;  %v877_v15 = vld [vmem:[#allocation2 + $0x98] sm:$0xff]  ;;  %v93_v16 = vadd.f32 %v873_v13, %v871_v12  ;;  %v885_v19 = vld [vmem:[#allocation2 + $0x48] sm:$0xff]  ;;  %v946_v61 = vsub.s32 %v167_v56, %v943_v57  ;;  %s622_s21 = sshll.u32 %s780_s2, 4  ;;  %s623_s21 = int_to_ptr.vmem [resolvable:$true] %s622_s21 }
  0x3b   :  { %v111_v17 = vadd.f32 %v877_v15, %v875_v14  ;;  %v887_v20 = vld [vmem:[#allocation2 + $0xa0] sm:$0xff]  ;;  %v889_v21 = vld [vmem:[#allocation2 + $0xa8] sm:$0xff]  ;;  %v96_v22 = vadd.f32 %v885_v19, %v883_v18  ;;  %v895_v24 = vld [vmem:[#allocation2 + $0x50] sm:$0xff]  ;;  %s747_s22 = scalar_lea.vmem %s623_s21, 4096  ;;  %p752_p11 = scmp.lt.s32.totalorder %s623_s21, %s623_s21 }
  0x3c   :  { %v114_v23 = vadd.f32 %v889_v21, %v887_v20  ;;  %v897_v25 = vld [vmem:[#allocation2 + $0x58] sm:$0xff]  ;;  %v899_v26 = vld [vmem:[#allocation2 + $0xb0] sm:$0xff]  ;;  %v907_v30 = vld [vmem:[#allocation2 + $0x60] sm:$0xff]  ;;  %p748_p10 = scmp.ne.s32.totalorder %s623_s21, %s747_s22  ;;  %p753_p12 = scmp.lt.s32.totalorder %s747_s22, %s747_s22 }
  0x3d   :  { %109 = vadd.xlane.f32.xlu1 %v108_v10  ;;  %v901_v27 = vld [vmem:[#allocation2 + $0xb8] sm:$0xff]  ;;  %v99_v28 = vadd.f32 %v897_v25, %v895_v24  ;;  %v909_v31 = vld [vmem:[#allocation2 + $0x68] sm:$0xff]  ;;  %v911_v32 = vld [vmem:[#allocation2 + $0xc0] sm:$0xff] }
  0x3e   :  { %88 = vadd.xlane.f32.xlu0 %v87_v11  ;;  %v117_v29 = vadd.f32 %v901_v27, %v899_v26  ;;  %v913_v33 = vld [vmem:[#allocation2 + $0xc8] sm:$0xff]  ;;  %v102_v34 = vadd.f32 %v909_v31, %v907_v30  ;;  %v919_v36 = vld [vmem:[#allocation2 + $0x70] sm:$0xff]  ;;  %v921_v37 = vld [vmem:[#allocation2 + $0x78] sm:$0xff]  ;;  %p754_p13 = por %p753_p12, %p752_p11 }
  0x3f   :  { %v120_v35 = vadd.f32 %v913_v33, %v911_v32  ;;  %v923_v38 = vld [vmem:[#allocation2 + $0xd0] sm:$0xff]  ;;  %v925_v39 = vld [vmem:[#allocation2 + $0xd8] sm:$0xff]  ;;  %v105_v40 = vadd.f32 %v921_v37, %v919_v36  ;;  %v935_v44 = vld [vmem:[#allocation2 + $0xe0] sm:$0xff] }
  0x40   :  { %v123_v41 = vadd.f32 %v925_v39, %v923_v38  ;;  %v931_v42 = vld [vmem:[#allocation2 + $0xf0] sm:$0xff]  ;;  %v933_v43 = vld [vmem:[#allocation2 + $0xf8] sm:$0xff]  ;;  %v937_v45 = vld [vmem:[#allocation2 + $0xe8] sm:$0xff]  ;;  %p755_p0 = pnand %p754_p13, %p748_p10 }
  0x41   :  { %94 = vadd.xlane.f32.xlu1 %v93_v16  ;;  %v129_v46 = vadd.f32 %v933_v43, %v931_v42  ;;  %v126_v47 = vadd.f32 %v937_v45, %v935_v44  ;;  %v149_v48 = vld [vmem:[#allocation5] sm:$0xff] }
  0x42   :  { %112 = vadd.xlane.f32.xlu0 %v111_v17  ;;  %649 = vmatprep.subr.mxu0 %v149_v48 }
  0x43   :  { %650 = vmatpush3.msra.mxu0 %v149_v48 }
  0x45   :  { %97 = vadd.xlane.f32.xlu1 %v96_v22 }
  0x46   :  { %115 = vadd.xlane.f32.xlu0 %v114_v23 }
  0x49   :  { %100 = vadd.xlane.f32.xlu1 %v99_v28 }
  0x4a   :  { %118 = vadd.xlane.f32.xlu0 %v117_v29 }
  0x4d   :  { %103 = vadd.xlane.f32.xlu1 %v102_v34 }
  0x4e   :  { %121 = vadd.xlane.f32.xlu0 %v120_v35 }
  0x51   :  { %106 = vadd.xlane.f32.xlu1 %v105_v40 }
  0x52   :  { %124 = vadd.xlane.f32.xlu0 %v123_v41 }
  0x55   :  { %130 = vadd.xlane.f32.xlu1 %v129_v46 }
  0x56   :  { %127 = vadd.xlane.f32.xlu0 %v126_v47 }
  0xc6   :  { %v92_v49 = vpop.xlane.xlu1 %91 }
  0xc7   :  { %v86_v50 = vpop.xlane.xlu0 %85  ;;  %v135_v11 = vmul.f32 0.00390625, %v92_v49 }
  0xc8   :  { %v133_v62 = vmul.f32 0.00390625, %v86_v50 }
  0xc9   :  { %v179_v41 = vrot.slane %v135_v11, %v946_v61 }
  0xca   :  { %v110_v51 = vpop.xlane.xlu1 %109  ;;  %v171_v17 = vrot.slane %v133_v62, %v946_v61 }
  0xcb   :  { %v89_v52 = vpop.xlane.xlu0 %88  ;;  %v141_v48 = vmul.f32 0.00390625, %v110_v51 }
  0xcc   :  { %v134_v59 = vmul.f32 0.00390625, %v89_v52 }
  0xce   :  { %v95_v54 = vpop.xlane.xlu1 %94  ;;  %v175_v3 = vrot.slane %v134_v59, %v946_v61 }
  0xcf   :  { %v113_v55 = vpop.xlane.xlu0 %112  ;;  %v136_v7 = vmul.f32 0.00390625, %v95_v54 }
  0xd0   :  { %v233_v28 = vsel %vm232_vm0, %v175_v3, %v171_v17  ;;  %v142_v34 = vmul.f32 0.00390625, %v113_v55  ;;  %v203_v3 = vrot.slane %v141_v48, %v946_v61 }
  0xd1   :  { %v183_v29 = vrot.slane %v136_v7, %v946_v61  ;;  %v235_v52 = vsel %vm234_vm1, %v179_v41, %v233_v28 }
  0xd2   :  { %v98_v58 = vpop.xlane.xlu1 %97 }
  0xd3   :  { %v116_v60 = vpop.xlane.xlu0 %115  ;;  %v137_v16 = vmul.f32 0.00390625, %v98_v58  ;;  %v237_v55 = vsel %vm236_vm2, %v183_v29, %v235_v52  ;;  %v207_v58 = vrot.slane %v142_v34, %v946_v61 }
  0xd4   :  { %v143_v47 = vmul.f32 0.00390625, %v116_v60 }
  0xd5   :  { %v187_v46 = vrot.slane %v137_v16, %v946_v61 }
  0xd6   :  { %v101_v63 = vpop.xlane.xlu1 %100  ;;  %v211_v60 = vrot.slane %v143_v47, %v946_v61 }
  0xd7   :  { %v119_v10 = vpop.xlane.xlu0 %118  ;;  %v138_v22 = vmul.f32 0.00390625, %v101_v63  ;;  %v239_v51 = vsel %vm238_vm3, %v187_v46, %v237_v55 }
  0xd8   :  { %v144_v50 = vmul.f32 0.00390625, %v119_v10 }
  0xd9   :  { %v191_v49 = vrot.slane %v138_v22, %v946_v61 }
  0xda   :  { %v104_v23 = vpop.xlane.xlu1 %103  ;;  %v215_v7 = vrot.slane %v144_v50, %v946_v61 }
  0xdb   :  { %v139_v35 = vmul.f32 0.00390625, %v104_v23  ;;  %v122_v40 = vpop.xlane.xlu0 %121  ;;  %v241_v11 = vsel %vm240_vm4, %v191_v49, %v239_v51  ;;  %v246_v23 = vsel %vm232_vm0, %v207_v58, %v203_v3 }
  0xdc   :  { %v145_v54 = vmul.f32 0.00390625, %v122_v40  ;;  %v247_v40 = vsel %vm234_vm1, %v211_v60, %v246_v23 }
  0xdd   :  { %v195_v53 = vrot.slane %v139_v35, %v946_v61  ;;  %v248_v46 = vsel %vm236_vm2, %v215_v7, %v247_v40  ;;  %v443_v40 = vsub.s32 0, %v943_v57 }
  0xde   :  { %v107_v56 = vpop.xlane.xlu1 %106  ;;  %v219_v16 = vrot.slane %v145_v54, %v946_v61  ;;  %v347_v54 = vld [vmem:[#allocation7] sm:$0xff] }
  0xdf   :  { %v140_v59 = vmul.f32 0.00390625, %v107_v56  ;;  %v125_v62 = vpop.xlane.xlu0 %124  ;;  %v243_v22 = vsel %vm242_vm5, %v195_v53, %v241_v11  ;;  %654 = vmatprep.subr.mxu1 %v347_v54 }
  0xe0   :  { %v146_v63 = vmul.f32 0.00390625, %v125_v62  ;;  %v249_v48 = vsel %vm238_vm3, %v219_v16, %v248_v46  ;;  %655 = vmatpush3.msra.mxu1 %v347_v54  ;;  %v471_v54 = vsub.s32 4, %v943_v57 }
  0xe1   :  { %v199_v10 = vrot.slane %v140_v59, %v946_v61 }
  0xe2   :  { %v131_v17 = vpop.xlane.xlu1 %130  ;;  %v223_v28 = vrot.slane %v146_v63, %v946_v61 }
  0xe3   :  { %v128_v29 = vpop.xlane.xlu0 %127  ;;  %v148_v34 = vmul.f32 0.00390625, %v131_v17  ;;  %v245_v35 = vsel %vm244_vm6, %v199_v10, %v243_v22 }
  0xe4   :  { %v147_v41 = vmul.f32 0.00390625, %v128_v29  ;;  %651 = vmatprep.mubr.msk.f32.mxu0 %vm253_vm7, %v245_v35  ;;  %v250_v50 = vsel %vm240_vm4, %v223_v28, %v249_v48  ;;  %v450_v35 = vsub.s32 1, %v943_v57  ;;  %v464_v48 = vsub.s32 3, %v943_v57 }
  0xe5   :  { %v231_v47 = vrot.slane %v148_v34, %v946_v61 }
  0xe6   :  { %v227_v49 = vrot.slane %v147_v41, %v946_v61 }
  0xe8   :  { %v251_v52 = vsel %vm242_vm5, %v227_v49, %v250_v50  ;;  %v457_v49 = vsub.s32 2, %v943_v57 }
  0xe9   :  { %v252_v53 = vsel %vm244_vm6, %v231_v47, %v251_v52 }
  0xea   :  { %652 = vmatmul.mubr.msk.f32.vlgmr.msra.gmra.mrb[0].mxu0 %vm253_vm7, %v252_v53  ;;  %v478_v53 = vsub.s32 5, %v943_v57 }
 0x1bd   :  { %v653_v56 = vpop.f32.mrb[0].mxu0 }
 0x1be   :  { %v638_v55 = vmul.f32 -1.442695, %v653_v56  ;;  %v324_v58 = vpop.f32.mrb[1].mxu0 }
 0x1bf   :  { %v637_v59 = vmul.f32 -1.442695, %v324_v58 }
 0x1c0   :  { %665 = vpow2.f32 %v638_v55 }
 0x1c1   :  { %667 = vpow2.f32 %v637_v59 }
 0x1ca   :  { %v666_v62 = vpop.eup %665 }
 0x1cb   :  { %v668_v51 = vpop.eup %667  ;;  %v340_v61 = vadd.f32 1.0, %v666_v62 }
 0x1cc   :  { %v339_v60 = vadd.f32 1.0, %v668_v51 }
 0x1cd   :  { %669 = vrcp.f32 %v340_v61 }
 0x1ce   :  { %671 = vrcp.f32 %v339_v60  ;;  %v485_v60 = vsub.s32 6, %v943_v57 }
 0x1d7   :  { %v670_v63 = vpop.eup %669 }
 0x1d8   :  { %v672_v3 = vpop.eup %671  ;;  %v346_v10 = vmul.f32 %v670_v63, %v653_v56 }
 0x1d9   :  { %v345_v7 = vmul.f32 %v672_v3, %v324_v58 }
 0x1db   :  { %656 = vmatprep.mubr.msk.f32.mxu1 %vm253_vm7, %v345_v7 }
 0x1dc   :  { %657 = vmatmul.mubr.msk.f32.vlgmr.msra.gmra.mrb[0].mxu1 %vm253_vm7, %v346_v10 }
 0x2af   :  { %v658_v11 = vpop.f32.mrb[0].mxu1 }
 0x2b0   :  { %v642_v16 = vmul.f32 -1.442695, %v658_v11  ;;  %v420_v17 = vpop.f32.mrb[1].mxu1  ;;  %v492_v11 = vsub.s32 7, %v943_v57 }
 0x2b1   :  { %v641_v22 = vmul.f32 -1.442695, %v420_v17 }
 0x2b2   :  { %673 = vpow2.f32 %v642_v16 }
 0x2b3   :  { %675 = vpow2.f32 %v641_v22 }
 0x2bc   :  { %v674_v23 = vpop.eup %673 }
 0x2bd   :  { %v436_v28 = vadd.f32 1.0, %v674_v23  ;;  %v676_v29 = vpop.eup %675 }
 0x2be   :  { %v435_v34 = vadd.f32 1.0, %v676_v29 }
 0x2bf   :  { %677 = vrcp.f32 %v436_v28 }
 0x2c0   :  { %679 = vrcp.f32 %v435_v34 }
 0x2c9   :  { %v678_v41 = vpop.eup %677 }
 0x2ca   :  { %v507_v46 = vrot.slane %v678_v41, %v450_v35  ;;  %v500_v47 = vrot.slane %v678_v41, %v443_v40  ;;  %v521_v50 = vrot.slane %v678_v41, %v464_v48  ;;  %v514_v52 = vrot.slane %v678_v41, %v457_v49  ;;  %v680_v58 = vpop.eup %679 }
 0x2cb   :  { %v535_v56 = vrot.slane %v678_v41, %v478_v53  ;;  %v528_v55 = vrot.slane %v678_v41, %v471_v54  ;;  %v451_v59 = vrot.slane %v680_v58, %v450_v35  ;;  %v444_v62 = vrot.slane %v680_v58, %v443_v40 }
 0x2cc   :  { %509 = vbcast.lane.b32.xlu1 %v507_v46, 256  ;;  %502 = vbcast.lane.b32.xlu0 %v500_v47, 256  ;;  %v458_v51 = vrot.slane %v680_v58, %v457_v49  ;;  %v472_v61 = vrot.slane %v680_v58, %v471_v54  ;;  %v465_v63 = vrot.slane %v680_v58, %v464_v48 }
 0x2cd   :  { %v486_v3 = vrot.slane %v680_v58, %v485_v60  ;;  %v479_v7 = vrot.slane %v680_v58, %v478_v53  ;;  %v542_v10 = vrot.slane %v678_v41, %v485_v60  ;;  %v493_v16 = vrot.slane %v680_v58, %v492_v11 }
 0x2ce   :  { %v549_v17 = vrot.slane %v678_v41, %v492_v11 }
 0x2d0   :  { %523 = vbcast.lane.b32.xlu1 %v521_v50, 256  ;;  %516 = vbcast.lane.b32.xlu0 %v514_v52, 256 }
 0x2d4   :  { %537 = vbcast.lane.b32.xlu1 %v535_v56, 256  ;;  %530 = vbcast.lane.b32.xlu0 %v528_v55, 256 }
 0x2d8   :  { %453 = vbcast.lane.b32.xlu1 %v451_v59, 256  ;;  %446 = vbcast.lane.b32.xlu0 %v444_v62, 256 }
 0x2dc   :  { %460 = vbcast.lane.b32.xlu1 %v458_v51, 256  ;;  %474 = vbcast.lane.b32.xlu0 %v472_v61, 256 }
 0x2e0   :  { %467 = vbcast.lane.b32.xlu1 %v465_v63, 256  ;;  %488 = vbcast.lane.b32.xlu0 %v486_v3, 256 }
 0x2e4   :  { %481 = vbcast.lane.b32.xlu1 %v479_v7, 256  ;;  %544 = vbcast.lane.b32.xlu0 %v542_v10, 256 }
 0x2e8   :  { %495 = vbcast.lane.b32.xlu1 %v493_v16, 256 }
 0x2ec   :  { %551 = vbcast.lane.b32.xlu1 %v549_v17, 256 }
 0x33e   :  { %v510_v22 = vpop.permute.xlu1 %509  ;;  %v503_v23 = vpop.permute.xlu0 %502 }
 0x33f   :  { %v571_v28 = vmul.f32 %v510_v22, %v875_v14  ;;  %v572_v29 = vmul.f32 %v510_v22, %v877_v15  ;;  %v569_v34 = vmul.f32 %v503_v23, %v857_v5  ;;  %v570_v35 = vmul.f32 %v503_v23, %v859_v6 }
 0x341   :  { %603 = vst [vmem:[#allocation8 + $0x90] sm:$0xff] %v571_v28  ;;  %604 = vst [vmem:[#allocation8 + $0x98] sm:$0xff] %v572_v29 }
 0x342   :  { %601 = vst [vmem:[#allocation8 + $0x80] sm:$0xff] %v569_v34  ;;  %602 = vst [vmem:[#allocation8 + $0x88] sm:$0xff] %v570_v35  ;;  %v524_v57 = vpop.permute.xlu1 %523  ;;  %v517_v40 = vpop.permute.xlu0 %516 }
 0x343   :  { %v575_v46 = vmul.f32 %v524_v57, %v899_v26  ;;  %v576_v41 = vmul.f32 %v524_v57, %v901_v27  ;;  %v573_v47 = vmul.f32 %v517_v40, %v887_v20  ;;  %v574_v14 = vmul.f32 %v517_v40, %v889_v21 }
 0x345   :  { %607 = vst [vmem:[#allocation8 + $0xb0] sm:$0xff] %v575_v46  ;;  %608 = vst [vmem:[#allocation8 + $0xb8] sm:$0xff] %v576_v41 }
 0x346   :  { %605 = vst [vmem:[#allocation8 + $0xa0] sm:$0xff] %v573_v47  ;;  %606 = vst [vmem:[#allocation8 + $0xa8] sm:$0xff] %v574_v14  ;;  %v538_v5 = vpop.permute.xlu1 %537  ;;  %v531_v6 = vpop.permute.xlu0 %530 }
 0x347   :  { %v579_v15 = vmul.f32 %v538_v5, %v923_v38  ;;  %v580_v48 = vmul.f32 %v538_v5, %v925_v39  ;;  %v577_v49 = vmul.f32 %v531_v6, %v911_v32  ;;  %v578_v26 = vmul.f32 %v531_v6, %v913_v33 }
 0x349   :  { %611 = vst [vmem:[#allocation8 + $0xd0] sm:$0xff] %v579_v15  ;;  %612 = vst [vmem:[#allocation8 + $0xd8] sm:$0xff] %v580_v48 }
 0x34a   :  { %609 = vst [vmem:[#allocation8 + $0xc0] sm:$0xff] %v577_v49  ;;  %610 = vst [vmem:[#allocation8 + $0xc8] sm:$0xff] %v578_v26  ;;  %v454_v20 = vpop.permute.xlu1 %453  ;;  %v447_v21 = vpop.permute.xlu0 %446 }
 0x34b   :  { %v555_v27 = vmul.f32 %v454_v20, %v863_v8  ;;  %v556_v50 = vmul.f32 %v454_v20, %v865_v9  ;;  %v553_v52 = vmul.f32 %v447_v21, %v851_v2  ;;  %v554_v38 = vmul.f32 %v447_v21, %v855_v4 }
 0x34d   :  { %587 = vst [vmem:[#allocation8 + $0x10] sm:$0xff] %v555_v27  ;;  %588 = vst [vmem:[#allocation8 + $0x18] sm:$0xff] %v556_v50 }
 0x34e   :  { %585 = vst [vmem:[#allocation8] sm:$0xff] %v553_v52  ;;  %586 = vst [vmem:[#allocation8 + $0x8] sm:$0xff] %v554_v38  ;;  %v461_v32 = vpop.permute.xlu1 %460  ;;  %v475_v33 = vpop.permute.xlu0 %474 }
 0x34f   :  { %v557_v39 = vmul.f32 %v461_v32, %v847_v0  ;;  %v558_v53 = vmul.f32 %v461_v32, %v849_v1  ;;  %v561_v54 = vmul.f32 %v475_v33, %v883_v18  ;;  %v562_v8 = vmul.f32 %v475_v33, %v885_v19 }
 0x351   :  { %589 = vst [vmem:[#allocation8 + $0x20] sm:$0xff] %v557_v39  ;;  %590 = vst [vmem:[#allocation8 + $0x28] sm:$0xff] %v558_v53 }
 0x352   :  { %593 = vst [vmem:[#allocation8 + $0x40] sm:$0xff] %v561_v54  ;;  %594 = vst [vmem:[#allocation8 + $0x48] sm:$0xff] %v562_v8  ;;  %v468_v2 = vpop.permute.xlu1 %467  ;;  %v489_v4 = vpop.permute.xlu0 %488 }
 0x353   :  { %v559_v9 = vmul.f32 %v468_v2, %v871_v12  ;;  %v560_v56 = vmul.f32 %v468_v2, %v873_v13  ;;  %v565_v55 = vmul.f32 %v489_v4, %v907_v30  ;;  %v566_v0 = vmul.f32 %v489_v4, %v909_v31 }
 0x355   :  { %591 = vst [vmem:[#allocation8 + $0x30] sm:$0xff] %v559_v9  ;;  %592 = vst [vmem:[#allocation8 + $0x38] sm:$0xff] %v560_v56 }
 0x356   :  { %597 = vst [vmem:[#allocation8 + $0x60] sm:$0xff] %v565_v55  ;;  %598 = vst [vmem:[#allocation8 + $0x68] sm:$0xff] %v566_v0  ;;  %v482_v1 = vpop.permute.xlu1 %481  ;;  %v545_v18 = vpop.permute.xlu0 %544 }
 0x357   :  { %v563_v19 = vmul.f32 %v482_v1, %v895_v24  ;;  %v564_v58 = vmul.f32 %v482_v1, %v897_v25  ;;  %v581_v59 = vmul.f32 %v545_v18, %v935_v44  ;;  %v582_v12 = vmul.f32 %v545_v18, %v937_v45 }
 0x359   :  { %595 = vst [vmem:[#allocation8 + $0x50] sm:$0xff] %v563_v19  ;;  %596 = vst [vmem:[#allocation8 + $0x58] sm:$0xff] %v564_v58 }
 0x35a   :  { %613 = vst [vmem:[#allocation8 + $0xe0] sm:$0xff] %v581_v59  ;;  %614 = vst [vmem:[#allocation8 + $0xe8] sm:$0xff] %v582_v12  ;;  %v496_v13 = vpop.permute.xlu1 %495 }
 0x35b   :  { %v567_v30 = vmul.f32 %v496_v13, %v919_v36  ;;  %v568_v31 = vmul.f32 %v496_v13, %v921_v37 }
 0x35d   :  { %599 = vst [vmem:[#allocation8 + $0x70] sm:$0xff] %v567_v30  ;;  %600 = vst [vmem:[#allocation8 + $0x78] sm:$0xff] %v568_v31 }
 0x35e   :  { %v552_v24 = vpop.permute.xlu1 %551 }
 0x35f   :  { %v583_v25 = vmul.f32 %v552_v24, %v931_v42  ;;  %v584_v44 = vmul.f32 %v552_v24, %v933_v43 }
 0x361   :  { %615 = vst [vmem:[#allocation8 + $0xf0] sm:$0xff] %v583_v25  ;;  %616 = vst [vmem:[#allocation8 + $0xf8] sm:$0xff] %v584_v44 }
 0x362   :  { %758 = shalt.err (!%p755_p0)
}
 0x363   :  { %s759_s25 = scalar_lea.hbm %s1040_s3, 4096 }
 0x364   :  { %p760_p1 = scmp.ne.s32.totalorder %s1040_s3, %s759_s25  ;;  %p763_p2 = scmp.lt.u32.totalorder %s759_s25, %s1040_s3 }
 0x366   :  { %p765_p3 = pnand %p763_p2, %p760_p1 }
 0x368   :  { %768 = shalt.err (!%p765_p3)
}
 0x369   :  { %628 = dma.vmem_to_hbm [thread:$0]  %s623_s21, 4096, %s1040_s3, [#allocation4], %s777_s1, %s777_s1, %s778_s7  }
 0x36a   :  { %773 = dma.done.wait [#allocation4], 4096  }
 0x36b   :  { %774 = vsyncadd [#allocation4], 4294963200 }
 0x36c   :  { %632 = vsyncpa [#allocation3], 1 }
 0x36d   :  { %633 = vsyncpa [#allocation6], 1 }
 0x36e   :  { %634 = vsyncpa [#allocation4], 1 }

</bundles_post_ra>
